<compile_context>
chip_gen: v7x
topology: tpu7x:2x2x1
jax: 0.10.0
libtpu: 0.0.40
codegen_flags: <defaults>
</compile_context>

<pallas_src>
import jax
import jax.numpy as jnp
from jax.experimental import pallas as pl
from jax.experimental.pallas import tpu as pltpu


def _conv1x1_bn_kernel(x_ref, w_ref, b_ref, o_ref):
    # x_ref: (TM, Cin)       rows of the flattened (N*H*W, Cin) input
    # w_ref: (Cin, Cout_p)   1x1 conv weights with BN scale folded in
    # b_ref: (1, Cout_p)     folded BN bias
    # o_ref: (TM, Cout_p)
    y = jnp.dot(x_ref[...], w_ref[...], preferred_element_type=jnp.float32)
    o_ref[...] = (y + b_ref[...]).astype(o_ref.dtype)


def conv1x1_bn(x_nchw, weight_oihw, gamma, beta, running_mean, running_var,
               eps=1e-5, *, tm=256):
    """Conv1x1BN forward. x_nchw: (N, Cin, H, W) -> (N, Cout, H, W)."""
    N, Cin, H, W = x_nchw.shape
    Cout = weight_oihw.shape[0]

    # ---- Glue in plain JAX: layout, BN folding, channel/row padding ----
    x2d = jnp.transpose(x_nchw, (0, 2, 3, 1)).reshape(N * H * W, Cin)
    x2d = x2d.astype(jnp.float32)

    scale = (gamma / jnp.sqrt(running_var + eps)).astype(jnp.float32)   # (Cout,)
    bias = (beta - running_mean * scale).astype(jnp.float32)            # (Cout,)

    w2d = weight_oihw.reshape(Cout, Cin).astype(jnp.float32).T          # (Cin, Cout)
    w2d = w2d * scale[None, :]                                          # fold BN scale

    LANE = 128
    cout_p = ((Cout + LANE - 1) // LANE) * LANE                         # lane-dense Cout
    M = N * H * W
    tm = min(tm, ((M + 7) // 8) * 8)                                    # multiple of 8
    m_p = ((M + tm - 1) // tm) * tm

    x_p = jnp.pad(x2d, ((0, m_p - M), (0, 0)))
    w_p = jnp.pad(w2d, ((0, 0), (0, cout_p - Cout)))
    b_p = jnp.pad(bias.reshape(1, Cout), ((0, 0), (0, cout_p - Cout)))

    out = pl.pallas_call(
        _conv1x1_bn_kernel,
        out_shape=jax.ShapeDtypeStruct((m_p, cout_p), jnp.float32),
        grid_spec=pltpu.PrefetchScalarGridSpec(
            num_scalar_prefetch=0,
            grid=(m_p // tm,),
            in_specs=[
                pl.BlockSpec((tm, Cin), lambda i: (i, 0)),
                pl.BlockSpec((Cin, cout_p), lambda i: (0, 0)),
                pl.BlockSpec((1, cout_p), lambda i: (0, 0)),
            ],
            out_specs=pl.BlockSpec((tm, cout_p), lambda i: (i, 0)),
        ),
        compiler_params=pltpu.CompilerParams(
            dimension_semantics=("parallel",),
            vmem_limit_bytes=64 * 1024 * 1024,
        ),
    )(x_p, w_p, b_p)

    out = out[:M, :Cout].reshape(N, H, W, Cout)
    return jnp.transpose(out, (0, 3, 1, 2))  # back to NCHW


def _reference(x_nchw, weight_oihw, gamma, beta, running_mean, running_var, eps=1e-5):
    y = jax.lax.conv_general_dilated(
        x_nchw.astype(jnp.float32),
        weight_oihw.astype(jnp.float32),
        window_strides=(1, 1),
        padding="VALID",
        dimension_numbers=("NCHW", "OIHW", "NCHW"),
    )
    scale = gamma / jnp.sqrt(running_var + eps)
    bias = beta - running_mean * scale
    return y * scale[None, :, None, None] + bias[None, :, None, None]


if __name__ == "__main__":
    key = jax.random.PRNGKey(0)
    k_x, k_w, k_g, k_b, k_m, k_v = jax.random.split(key, 6)

    N, Cin, H, W = 2, 4, 16, 16
    Cout = 8

    x = jax.random.normal(k_x, (N, Cin, H, W), dtype=jnp.float32)
    weight = jax.random.normal(k_w, (Cout, Cin, 1, 1), dtype=jnp.float32) * 0.1
    gamma = 1.0 + 0.1 * jax.random.normal(k_g, (Cout,), dtype=jnp.float32)
    beta = 0.1 * jax.random.normal(k_b, (Cout,), dtype=jnp.float32)
    running_mean = 0.05 * jax.random.normal(k_m, (Cout,), dtype=jnp.float32)
    running_var = 1.0 + 0.1 * jnp.abs(jax.random.normal(k_v, (Cout,), dtype=jnp.float32))

    out = conv1x1_bn(x, weight, gamma, beta, running_mean, running_var)
    out = jax.block_until_ready(out)

    ref = jax.block_until_ready(
        _reference(x, weight, gamma, beta, running_mean, running_var)
    )
    assert out.shape == (N, Cout, H, W)
    assert jnp.allclose(out, ref, atol=1e-4, rtol=1e-4)
    print("KERNEL_OK")
</pallas_src>

<mosaic_0001>
module attributes {stable_mosaic.version = 11 : i64} {
  func.func @_conv1x1_bn_kernel(%arg0: i32, %arg1: memref<256x4xf32, #tpu.memory_space<vmem>>, %arg2: memref<4x128xf32, #tpu.memory_space<vmem>>, %arg3: memref<1x128xf32, #tpu.memory_space<vmem>>, %arg4: memref<256x128xf32, #tpu.memory_space<vmem>>) attributes {dimension_semantics = [#tpu.dimension_semantics<parallel>], iteration_bounds = array<i64: 2>, scalar_prefetch = 0 : i64, scratch_operands = 0 : i64, tpu.core_type = #tpu.core_type<tc>, window_params = [{transform_indices = @transform_0, window_bounds = array<i64: 256, 4>}, {pipeline_mode = #tpu.pipeline_mode<synchronous>, transform_indices = @transform_1, window_bounds = array<i64: 4, 128>}, {pipeline_mode = #tpu.pipeline_mode<synchronous>, transform_indices = @transform_2, window_bounds = array<i64: 1, 128>}, {transform_indices = @transform_3, window_bounds = array<i64: 256, 128>}]} {
    %c0 = arith.constant 0 : index
    %c0_0 = arith.constant 0 : index
    %0 = vector.load %arg1[%c0, %c0_0] : memref<256x4xf32, #tpu.memory_space<vmem>>, vector<256x4xf32>
    %c0_1 = arith.constant 0 : index
    %c0_2 = arith.constant 0 : index
    %1 = vector.load %arg2[%c0_1, %c0_2] : memref<4x128xf32, #tpu.memory_space<vmem>>, vector<4x128xf32>
    %cst = arith.constant dense<0.000000e+00> : vector<256x128xf32>
    %2 = tpu.matmul %0, %1, %cst {dimension_numbers = #tpu.dot_dimension_numbers<[1], [0], [0], [1], [0, 0, 1, 1], [], []>} : vector<256x4xf32>, vector<4x128xf32>, vector<256x128xf32> -> vector<256x128xf32>
    %c0_3 = arith.constant 0 : index
    %c0_4 = arith.constant 0 : index
    %3 = vector.load %arg3[%c0_3, %c0_4] : memref<1x128xf32, #tpu.memory_space<vmem>>, vector<1x128xf32>
    %4 = vector.broadcast %3 : vector<1x128xf32> to vector<256x128xf32>
    %5 = arith.addf %2, %4 : vector<256x128xf32>
    %c0_5 = arith.constant 0 : index
    %c0_6 = arith.constant 0 : index
    %6 = vector.load %arg4[%c0_5, %c0_6] : memref<256x128xf32, #tpu.memory_space<vmem>>, vector<256x128xf32>
    tpu.vector_store %arg4[%c0_5, %c0_6], %5 {strides = array<i32>} : memref<256x128xf32, #tpu.memory_space<vmem>>, vector<256x128xf32>,
    return
  }
  func.func @transform_0(%arg0: i32) -> (i32, i32) {
    %c0_i32 = arith.constant 0 : i32
    %c0_i32_0 = arith.constant 0 : i32
    return %arg0, %c0_i32 : i32, i32
  }
  func.func @transform_1(%arg0: i32) -> (i32, i32) {
    %c0_i32 = arith.constant 0 : i32
    %c0_i32_0 = arith.constant 0 : i32
    %c0_i32_1 = arith.constant 0 : i32
    return %c0_i32, %c0_i32_0 : i32, i32
  }
  func.func @transform_2(%arg0: i32) -> (i32, i32) {
    %c0_i32 = arith.constant 0 : i32
    %c0_i32_0 = arith.constant 0 : i32
    %c0_i32_1 = arith.constant 0 : i32
    return %c0_i32, %c0_i32_0 : i32, i32
  }
  func.func @transform_3(%arg0: i32) -> (i32, i32) {
    %c0_i32 = arith.constant 0 : i32
    %c0_i32_0 = arith.constant 0 : i32
    return %arg0, %c0_i32 : i32, i32
  }
}

</mosaic_0001>

<bundles_post_ra>
// kernel: tpu_custom_call.1
= control target key start
LH: loop header
LB: loop body
LE: loop exit
PB: predicated region body
PF: predicated region fallthrough
CT: control target
= control target key end

     0   :  { %8 = vsyncpa [#allocation3], 0  ;;  %s1487_s0 = inlined_call_operand.hbm [shape: f32[512,4], index: 0, kind: input, shape index: {}]   ;;  %s1488_s1 = inlined_call_operand.hbm [shape: f32[4,128], index: 1, kind: input, shape index: {}]   ;;  %s1489_s2 = inlined_call_operand.hbm [shape: f32[1,128], index: 2, kind: input, shape index: {}]   ;;  %s1490_s3 = inlined_call_operand.hbm [shape: f32[512,128], index: 3, kind: output, shape index: {}]  }
   0x1   :  { %10 = vsyncpa [#allocation3 + $0x1], 0 }
   0x2   :  { %11 = vsyncpa [#allocation6], 0 }
   0x3   :  { %12 = vsyncpa [#allocation4], 0 }
   0x4   :  { %14 = vsyncpa [#allocation4 + $0x1], 0  ;;  %s1116_s12 = smov 0   ;;  %s1118_s13 = smov 0  }
   0x5   :  { %s1120_s14 = smov 0   ;;  %s1122_s15 = smov 0  }
   0x6 LB: > { %s1137_s16 = sadd.s32 4294967295, %s1086_s15   ;;  %s720_s17 = sadd.s32 4294967294, %s1086_s15   ;;  %s1086_s15 = sphi %s1122_s15, %s1515_s15   ;;  %s1082_s14 = sphi %s1120_s14, %s1514_s14   ;;  %s1078_s13 = sphi %s1118_s13, %s1513_s13   ;;  %s1074_s12 = sphi %s1116_s12, %s1512_s12  }
   0x7   : > { %s1141_s18 = sadd.s32 1, %s1086_s15   ;;  %s27_s19 = sadd.s32 1, %s1082_s14 }
   0x8   : > { %s24_s20 = ssub.s32 %s1086_s15, %s1141_s18  ;;  %p34_p0 = scmp.ne.s32.totalorder %s1082_s14, %s1078_s13 }
   0x9   : > { %p25_p1 = scmp.eq.s32.totalorder %s24_s20, 0  ;;  %p35_p2 = scmp.eq.s32.totalorder %s1086_s15, 0 }
   0xa   : > { %p40_p3 = scmp.ne.s32.totalorder %s1078_s13, %s1074_s12  ;;  %p1491_p4 = scmp.eq.s32.totalorder %s1137_s16, 0 }
   0xb   : > { %s1153_s21 = scalar_select %p25_p1, %s1082_s14, %s27_s19  }
   0xc   : > { %p1155_p5 = por %p35_p2, %p34_p0  ;;  %p1161_p6 = por %p1491_p4, %p40_p3 }
   0xd   : > { %p106_p7 = scmp.eq.s32.totalorder %s1137_s16, 1  ;;  %p112_p8 = scmp.eq.s32.totalorder %s720_s17, 1 }
   0xe   : > { %s1497_s23 = scalar_select %p1161_p6, 1, 0 }
   0xf   : > { %p721_p9 = scmp.ge.s32.totalorder %s1086_s15, 1  ;;  %p119_p10 = scmp.lt.s32.totalorder %s1086_s15, 3 }
  0x10   : > { %p1168_p11 = por %p106_p7, %p34_p0  ;;  %p1172_p12 = por %p112_p8, %p40_p3 }
  0x11   : > { %p1176_p13 = pnand %p721_p9, %p119_p10  ;;  %s1088_s27 = smov [#allocation5]  }
  0x12   : > { %s1498_s24 = scalar_select %p1168_p11, 1, 0 }
  0x13   : > { %s1499_s25 = scalar_select %p1172_p12, 1, 0 }
  0x14   : > { %s1500_s26 = scalar_select %p1176_p13, 1, 0 }
  0x15   : > { %p871_p2 = pneg %p1176_p13  ;;  %s132_s28 = sshll.u32 %s1088_s27, 4  ;;  %s133_s28 = int_to_ptr.vmem [resolvable:$true] %s132_s28 }
  0x16   : > { %p888_p4 = scmp.lt.s32.totalorder %s1086_s15, 2  ;;  %p1501_p0 = scmp.eq.s32.totalorder %s1137_s16, 0 }
  0x17   : > { %s1089_s4 = smov [#allocation7]   ;;  %s930_s8 = scalar_lea.hbm %s1488_s1, 64 }
  0x18   : > { %p1186_p7 = pnand %p871_p2, %p1501_p0  ;;  %p1192_p3 = pnand %p888_p4, %p1155_p5 }
  0x19   : > { %s143_s5 = sshll.u32 %s1089_s4, 4  ;;  %p931_p8 = scmp.ne.s32.totalorder %s1488_s1, %s930_s8  ;;  %s1196_s5 = int_to_ptr.vmem [resolvable:$true] %s143_s5 }
  0x1a   : > { %s1503_s30 = scalar_select %p1192_p3, 1, 0 }
  0x1b   : > { %p932_p9 = pneg %p1186_p7  ;;  %p937_p10 = scmp.lt.u32.totalorder %s930_s8, %s1488_s1 }
  0x1d   : > { %p933_p4 = pnand %p932_p9, %p931_p8 }
  0x1f   : > { %p934_p5 = pneg %p933_p4 }
  0x21   : > { %p939_p2 = pnand %p937_p10, %p934_p5 }
  0x23   : > { %942 = shalt.err (!%p939_p2)
}
  0x24   : > { %s943_s19 = scalar_lea.vmem %s133_s28, 64  ;;  %p951_p11 = scmp.lt.s32.totalorder %s133_s28, %s133_s28 }
  0x25   : > { %p944_p0 = scmp.ne.s32.totalorder %s133_s28, %s943_s19  ;;  %p952_p6 = scmp.lt.s32.totalorder %s943_s19, %s943_s19 }
  0x27   : > { %p946_p1 = pnand %p944_p0, %p932_p9  ;;  %p953_p13 = por %p952_p6, %p951_p11 }
  0x29   : > { %p947_p12 = pneg %p946_p1 }
  0x2b   : > { %p954_p3 = pnand %p953_p13, %p947_p12 }
  0x2d   : > { %957 = shalt.err (!%p954_p3)
}
  0x2e   : > { %874 = dma.hbm_to_vmem [thread:$0]  (!%p1186_p7), %s1488_s1, 64, %s133_s28, [#allocation6]  }
  0x2f   : > { %s154_s27 = sand.u32 1, %s1082_s14   ;;  %s958_s7 = scalar_lea.hbm %s1489_s2, 16 }
  0x30   : > { %p959_p1 = scmp.ne.s32.totalorder %s1489_s2, %s958_s7  ;;  %p965_p12 = scmp.lt.u32.totalorder %s958_s7, %s1489_s2 }
  0x32   : > { %p961_p6 = pnand %p959_p1, %p932_p9 }
  0x34   : > { %p962_p11 = pneg %p961_p6 }
  0x36   : > { %p967_p13 = pnand %p965_p12, %p962_p11 }
  0x38   : > { %970 = shalt.err (!%p967_p13)
}
  0x39   : > { %s971_s28 = scalar_lea.vmem %s1196_s5, 16  ;;  %s978_s17 = scalar_lea.vmem %s1196_s5, 32 }
  0x3a   : > { %p972_p3 = scmp.ne.s32.totalorder %s1196_s5, %s971_s28  ;;  %p979_p5 = scmp.lt.s32.totalorder %s1196_s5, %s1196_s5 }
  0x3b   : > { %p980_p10 = scmp.lt.s32.totalorder %s978_s17, %s971_s28 }
  0x3c   : > { %p974_p8 = pnand %p972_p3, %p932_p9 }
  0x3d   : > { %p981_p2 = por %p980_p10, %p979_p5 }
  0x3e   : > { %p975_p4 = pneg %p974_p8 }
  0x40   : > { %p982_p0 = pnand %p981_p2, %p975_p4 }
  0x42   : > { %985 = shalt.err (!%p982_p0)
}
  0x43   : > { %877 = dma.hbm_to_vmem [thread:$0]  (!%p1186_p7), %s1489_s2, 16, %s1196_s5, [#allocation6]  }
  0x44   : > { %s725_s22 = sshll.u32 %s154_s27, 8  ;;  %s772_s4 = sshll.u32 %s1086_s15, 12 }
  0x45   : > { %s1251_s8 = scalar_lea.hbm %s1487_s0, %s772_s4  ;;  %s158_s29 = scalar_lea.vmem [#allocation2], %s725_s22 }
  0x46   : > { %s165_s9 = sshll.u32 %s158_s29, 4  ;;  %s1255_s10 = scalar_lea.sflag [#allocation3], %s154_s27  ;;  %s1253_s9 = int_to_ptr.vmem [resolvable:$true] %s165_s9 }
  0x47   : > { %s986_s11 = scalar_lea.hbm %s1251_s8, 4096  ;;  %p1504_p7 = scmp.ne.s32.totalorder %s1503_s30, 0 }
  0x48   : > { %p987_p9 = scmp.ne.s32.totalorder %s1251_s8, %s986_s11  ;;  %s991_s17 = scalar_lea.hbm %s1487_s0, 8192 }
  0x49   : > { %p988_p1 = pneg %p1504_p7  ;;  %p992_p12 = scmp.lt.u32.totalorder %s1251_s8, %s1487_s0 }
  0x4a   : > { %p993_p13 = scmp.lt.u32.totalorder %s991_s17, %s986_s11  ;;  %p995_p8 = scmp.lt.u32.totalorder %s986_s11, %s1251_s8 }
  0x4b   : > { %p989_p6 = pnand %p988_p1, %p987_p9 }
  0x4c   : > { %p994_p3 = por %p993_p13, %p992_p12 }
  0x4d   : > { %p990_p11 = pneg %p989_p6 }
  0x4e   : > { %p996_p4 = por %p995_p8, %p994_p3 }
  0x50   : > { %p997_p5 = pnand %p996_p4, %p990_p11 }
  0x52   : > { %1000 = shalt.err (!%p997_p5)
}
  0x53   : > { %s1001_s27 = scalar_lea.vmem %s1253_s9, 4096  ;;  %s1090_s22 = smov [#allocation2]  }
  0x54   : > { %p1002_p10 = scmp.ne.s32.totalorder %s1253_s9, %s1001_s27  ;;  %s1006_s4 = sshll.u32 %s1090_s22, 4  ;;  %s1007_s4 = int_to_ptr.vmem [resolvable:$false] %s1006_s4 }
  0x55   : > { %s1008_s6 = scalar_lea.vmem %s1007_s4, 8192  ;;  %p1009_p9 = scmp.lt.s32.totalorder %s1253_s9, %s1007_s4 }
  0x56   : > { %p1004_p2 = pnand %p1002_p10, %p988_p1  ;;  %p1010_p6 = scmp.lt.s32.totalorder %s1008_s6, %s1001_s27 }
  0x58   : > { %p1005_p0 = pneg %p1004_p2  ;;  %p1011_p12 = por %p1010_p6, %p1009_p9 }
  0x5a   : > { %p1012_p13 = pnand %p1011_p12, %p1005_p0 }
  0x5c   : > { %1015 = shalt.err (!%p1012_p13)
}
  0x5d   : > { %s1091_s7 = smov 128   ;;  %s1092_s29 = smov 8  }
  0x5e   : > { %881 = dma.hbm_to_vmem [thread:$0]  (!%p1504_p7), %s1251_s8, 4096, %s1253_s9, %s1255_s10, %s1091_s7, %s1091_s7, %s1092_s29  }
  0x5f   : > { %p1505_p1 = scmp.ne.s32.totalorder %s1500_s26, 0 }
  0x60   : > { %s1286_s11 = sand.u32 (!%p1505_p1), 1, %s1078_s13   ;;  %p1506_p11 = scmp.ne.s32.totalorder (!%p1505_p1), %s1497_s23, 0 }
  0x61   : > { %177 = sbr.rel (%p1505_p1) target bundleno = 370 (0x172), region = 32  ;;  %s729_s5 = sshll.u32 (!%p1505_p1), %s1286_s11, 8 }
  0x62   : > { %s180_s28 = scalar_lea.sflag (!%p1505_p1), [#allocation3], %s1286_s11  ;;  %s1292_s17 = scalar_lea.vmem (!%p1505_p1), [#allocation2], %s729_s5 }
  0x68   : > { %1061 = dma.done.wait (%p1506_p11), %s180_s28, 4096  }
  0x69   : > { %1063 = vsyncadd (%p1506_p11), %s180_s28, 4294963200  ;;  %p1507_p7 = scmp.eq.s32.totalorder %s1137_s16, 0 }
  0x6b   : > { %1065 = dma.done.wait (%p1507_p7), [#allocation6], 80   ;;  %p1508_p3 = pmov %p1507_p7 }
  0x6c   : > { %vm353_vm0 = vcmask 1043456   ;;  %v248_v0 = vld [vmem:[#allocation5] sm:$0xf]  ;;  %vm256_vm1 = vcmask 31744   ;;  %v217_v3 = vld [vmem:[%s1292_s17 + $0x8] sm:$0xff]  ;;  %v218_v5 = vld [vmem:[%s1292_s17 + $0x10] sm:$0xff] }
  0x6d   : > { %1067 = vsyncadd (%p1508_p3), [#allocation6], 4294967216  ;;  %v216_v1 = vld [vmem:[%s1292_s17] sm:$0xff]  ;;  %807 = vmatprep.subr.msk.mxu0 %vm353_vm0, %v248_v0  ;;  %857 = vmatprep.subr.msk.mxu1 %vm353_vm0, %v248_v0  ;;  %v233_v4 = vld [vmem:[%s1292_s17 + $0x88] sm:$0xff]  ;;  %s1374_s23 = scalar_lea.vmem [#allocation8], %s729_s5  ;;  %s773_s26 = sshll.u32 %s1137_s16, 12 }
  0x6e   : > { %v232_v2 = vld [vmem:[%s1292_s17 + $0x80] sm:$0xff]  ;;  %808 = vmatpush3.msk.msra.mxu0 %vm353_vm0, %v248_v0  ;;  %858 = vmatpush3.msk.msra.mxu1 %vm353_vm0, %v248_v0  ;;  %v234_v6 = vld [vmem:[%s1292_s17 + $0x90] sm:$0xff]  ;;  %v219_v7 = vld [vmem:[%s1292_s17 + $0x18] sm:$0xff]  ;;  %s628_s30 = sshll.u32 %s1374_s23, 4  ;;  %s1435_s9 = scalar_lea.hbm %s1490_s3, %s773_s26  ;;  %s1437_s30 = int_to_ptr.vmem [resolvable:$true] %s628_s30 }
  0x6f   : > { %809 = vmatprep.mubr.msk.f32.mxu0 %vm256_vm1, %v216_v1  ;;  %833 = vmatprep.mubr.msk.f32.mxu1 %vm256_vm1, %v232_v2  ;;  %v235_v8 = vld [vmem:[%s1292_s17 + $0x98] sm:$0xff]  ;;  %v220_v9 = vld [vmem:[%s1292_s17 + $0x20] sm:$0xff]  ;;  %v221_v11 = vld [vmem:[%s1292_s17 + $0x28] sm:$0xff]  ;;  %s615_s10 = scalar_lea.sflag [#allocation4], %s1286_s11  ;;  %s1016_s19 = scalar_lea.vmem %s1437_s30, 4096 }
  0x70   : > { %810 = vmatmul.mubr.msk.f32.vlgmr.msra.gmra.mrb[0].mxu0 %vm256_vm1, %v217_v3  ;;  %834 = vmatmul.mubr.msk.f32.vlgmr.msra.gmra.mrb[0].mxu1 %vm256_vm1, %v233_v4  ;;  %v236_v10 = vld [vmem:[%s1292_s17 + $0xa0] sm:$0xff]  ;;  %v237_v12 = vld [vmem:[%s1292_s17 + $0xa8] sm:$0xff]  ;;  %v222_v13 = vld [vmem:[%s1292_s17 + $0x30] sm:$0xff]  ;;  %p1017_p8 = scmp.ne.s32.totalorder %s1437_s30, %s1016_s19  ;;  %p1509_p4 = scmp.ne.s32.totalorder %s1498_s24, 0 }
  0x71   : > { %812 = vmatprep.mubr.msk.f32.mxu0 %vm256_vm1, %v218_v5  ;;  %836 = vmatprep.mubr.msk.f32.mxu1 %vm256_vm1, %v234_v6  ;;  %v238_v14 = vld [vmem:[%s1292_s17 + $0xb0] sm:$0xff]  ;;  %v223_v15 = vld [vmem:[%s1292_s17 + $0x38] sm:$0xff]  ;;  %v224_v17 = vld [vmem:[%s1292_s17 + $0x40] sm:$0xff]  ;;  %s1093_s20 = smov [#allocation8]  }
  0x72   : > { %v239_v16 = vld [vmem:[%s1292_s17 + $0xb8] sm:$0xff]  ;;  %v240_v18 = vld [vmem:[%s1292_s17 + $0xc0] sm:$0xff]  ;;  %v225_v19 = vld [vmem:[%s1292_s17 + $0x48] sm:$0xff]  ;;  %p1018_p5 = pnand %p1017_p8, %p1509_p4  ;;  %s1020_s27 = sshll.u32 %s1093_s20, 4  ;;  %s1021_s27 = int_to_ptr.vmem [resolvable:$false] %s1020_s27 }
  0x73   : > { %v241_v20 = vld [vmem:[%s1292_s17 + $0xc8] sm:$0xff]  ;;  %v226_v21 = vld [vmem:[%s1292_s17 + $0x50] sm:$0xff]  ;;  %v227_v23 = vld [vmem:[%s1292_s17 + $0x58] sm:$0xff]  ;;  %s1022_s22 = scalar_lea.vmem %s1021_s27, 8192  ;;  %p1023_p2 = scmp.lt.s32.totalorder %s1437_s30, %s1021_s27 }
  0x74   : > { %813 = vmatmul.mubr.msk.f32.gmra.mrb[2].mxu0 %vm256_vm1, %v219_v7  ;;  %837 = vmatmul.mubr.msk.f32.gmra.mrb[2].mxu1 %vm256_vm1, %v235_v8  ;;  %v242_v22 = vld [vmem:[%s1292_s17 + $0xd0] sm:$0xff]  ;;  %v243_v24 = vld [vmem:[%s1292_s17 + $0xd8] sm:$0xff]  ;;  %v228_v25 = vld [vmem:[%s1292_s17 + $0x60] sm:$0xff]  ;;  %p1019_p10 = pneg %p1018_p5  ;;  %p1024_p0 = scmp.lt.s32.totalorder %s1022_s22, %s1016_s19 }
  0x75   : > { %815 = vmatprep.mubr.msk.f32.mxu0 %vm256_vm1, %v220_v9  ;;  %839 = vmatprep.mubr.msk.f32.mxu1 %vm256_vm1, %v236_v10  ;;  %v244_v26 = vld [vmem:[%s1292_s17 + $0xe0] sm:$0xff]  ;;  %v229_v27 = vld [vmem:[%s1292_s17 + $0x68] sm:$0xff]  ;;  %v230_v29 = vld [vmem:[%s1292_s17 + $0x70] sm:$0xff] }
  0x76   : > { %v245_v28 = vld [vmem:[%s1292_s17 + $0xe8] sm:$0xff]  ;;  %v246_v30 = vld [vmem:[%s1292_s17 + $0xf0] sm:$0xff]  ;;  %v231_v31 = vld [vmem:[%s1292_s17 + $0x78] sm:$0xff]  ;;  %p1025_p9 = por %p1024_p0, %p1023_p2 }
  0x77   : > { %v247_v32 = vld [vmem:[%s1292_s17 + $0xf8] sm:$0xff]  ;;  %v1366_v33 = vld [vmem:[#allocation7] ss:$0 sm:$0xff] }
  0x78   : > { %816 = vmatmul.mubr.msk.f32.gmra.mrb[4].mxu0 %vm256_vm1, %v221_v11  ;;  %840 = vmatmul.mubr.msk.f32.gmra.mrb[4].mxu1 %vm256_vm1, %v237_v12  ;;  %p1026_p6 = pnand %p1025_p9, %p1019_p10 }
  0x79   : > { %818 = vmatprep.mubr.msk.f32.mxu0 %vm256_vm1, %v222_v13  ;;  %842 = vmatprep.mubr.msk.f32.mxu1 %vm256_vm1, %v238_v14 }
  0x7c   : > { %819 = vmatmul.mubr.msk.f32.gmra.mrb[6].mxu0 %vm256_vm1, %v223_v15  ;;  %843 = vmatmul.mubr.msk.f32.gmra.mrb[6].mxu1 %vm256_vm1, %v239_v16 }
  0x7d   : > { %821 = vmatprep.mubr.msk.f32.mxu0 %vm256_vm1, %v224_v17  ;;  %845 = vmatprep.mubr.msk.f32.mxu1 %vm256_vm1, %v240_v18 }
  0x80   : > { %822 = vmatmul.mubr.msk.f32.gmra.mrb[8].mxu0 %vm256_vm1, %v225_v19  ;;  %846 = vmatmul.mubr.msk.f32.gmra.mrb[8].mxu1 %vm256_vm1, %v241_v20 }
  0x81   : > { %824 = vmatprep.mubr.msk.f32.mxu0 %vm256_vm1, %v226_v21  ;;  %848 = vmatprep.mubr.msk.f32.mxu1 %vm256_vm1, %v242_v22 }
  0x84   : > { %825 = vmatmul.mubr.msk.f32.gmra.mrb[10].mxu0 %vm256_vm1, %v227_v23  ;;  %849 = vmatmul.mubr.msk.f32.gmra.mrb[10].mxu1 %vm256_vm1, %v243_v24 }
  0x85   : > { %827 = vmatprep.mubr.msk.f32.mxu0 %vm256_vm1, %v228_v25  ;;  %851 = vmatprep.mubr.msk.f32.mxu1 %vm256_vm1, %v244_v26 }
  0x88   : > { %828 = vmatmul.mubr.msk.f32.gmra.mrb[12].mxu0 %vm256_vm1, %v229_v27  ;;  %852 = vmatmul.mubr.msk.f32.gmra.mrb[12].mxu1 %vm256_vm1, %v245_v28 }
  0x89   : > { %830 = vmatprep.mubr.msk.f32.mxu0 %vm256_vm1, %v230_v29  ;;  %854 = vmatprep.mubr.msk.f32.mxu1 %vm256_vm1, %v246_v30 }
  0x8c   : > { %831 = vmatmul.mubr.msk.f32.gmra.mrb[14].mxu0 %vm256_vm1, %v231_v31  ;;  %855 = vmatmul.mubr.msk.f32.gmra.mrb[14].mxu1 %vm256_vm1, %v247_v32 }
 0x143   : > { %v811_v34 = vpop.f32.mrb[0].mxu0  ;;  %v835_v35 = vpop.f32.mrb[0].mxu1 }
 0x144   : > { %v429_v36 = vadd.f32 %v811_v34, %v1366_v33  ;;  %v509_v37 = vadd.f32 %v835_v35, %v1366_v33  ;;  %v423_v38 = vpop.f32.mrb[1].mxu0  ;;  %v503_v39 = vpop.f32.mrb[1].mxu1 }
 0x145   : > { %v424_v40 = vadd.f32 %v1366_v33, %v423_v38  ;;  %v504_v41 = vadd.f32 %v1366_v33, %v503_v39 }
 0x146   : > { %583 = vst [vmem:[%s1374_s23 + $0x8] sm:$0xff] %v429_v36  ;;  %599 = vst [vmem:[%s1374_s23 + $0x88] sm:$0xff] %v509_v37 }
 0x147   : > { %582 = vst [vmem:[%s1374_s23] sm:$0xff] %v424_v40  ;;  %598 = vst [vmem:[%s1374_s23 + $0x80] sm:$0xff] %v504_v41  ;;  %v814_v42 = vpop.f32.mrb[2].mxu0  ;;  %v838_v43 = vpop.f32.mrb[2].mxu1 }
 0x148   : > { %v439_v44 = vadd.f32 %v814_v42, %v1366_v33  ;;  %v519_v45 = vadd.f32 %v838_v43, %v1366_v33  ;;  %v433_v46 = vpop.f32.mrb[3].mxu0  ;;  %v513_v47 = vpop.f32.mrb[3].mxu1 }
 0x149   : > { %v434_v48 = vadd.f32 %v1366_v33, %v433_v46  ;;  %v514_v49 = vadd.f32 %v1366_v33, %v513_v47 }
 0x14a   : > { %585 = vst [vmem:[%s1374_s23 + $0x18] sm:$0xff] %v439_v44  ;;  %601 = vst [vmem:[%s1374_s23 + $0x98] sm:$0xff] %v519_v45 }
 0x14b   : > { %584 = vst [vmem:[%s1374_s23 + $0x10] sm:$0xff] %v434_v48  ;;  %600 = vst [vmem:[%s1374_s23 + $0x90] sm:$0xff] %v514_v49  ;;  %v817_v50 = vpop.f32.mrb[4].mxu0  ;;  %v841_v51 = vpop.f32.mrb[4].mxu1 }
 0x14c   : > { %v449_v52 = vadd.f32 %v817_v50, %v1366_v33  ;;  %v529_v53 = vadd.f32 %v841_v51, %v1366_v33  ;;  %v443_v54 = vpop.f32.mrb[5].mxu0  ;;  %v523_v55 = vpop.f32.mrb[5].mxu1 }
 0x14d   : > { %v444_v56 = vadd.f32 %v1366_v33, %v443_v54  ;;  %v524_v57 = vadd.f32 %v1366_v33, %v523_v55 }
 0x14e   : > { %587 = vst [vmem:[%s1374_s23 + $0x28] sm:$0xff] %v449_v52  ;;  %603 = vst [vmem:[%s1374_s23 + $0xa8] sm:$0xff] %v529_v53 }
 0x14f   : > { %586 = vst [vmem:[%s1374_s23 + $0x20] sm:$0xff] %v444_v56  ;;  %602 = vst [vmem:[%s1374_s23 + $0xa0] sm:$0xff] %v524_v57  ;;  %v820_v58 = vpop.f32.mrb[6].mxu0  ;;  %v844_v59 = vpop.f32.mrb[6].mxu1 }
 0x150   : > { %v459_v60 = vadd.f32 %v820_v58, %v1366_v33  ;;  %v539_v61 = vadd.f32 %v844_v59, %v1366_v33  ;;  %v453_v62 = vpop.f32.mrb[7].mxu0  ;;  %v533_v63 = vpop.f32.mrb[7].mxu1 }
 0x151   : > { %v454_v0 = vadd.f32 %v1366_v33, %v453_v62  ;;  %v534_v1 = vadd.f32 %v1366_v33, %v533_v63 }
 0x152   : > { %589 = vst [vmem:[%s1374_s23 + $0x38] sm:$0xff] %v459_v60  ;;  %605 = vst [vmem:[%s1374_s23 + $0xb8] sm:$0xff] %v539_v61 }
 0x153   : > { %588 = vst [vmem:[%s1374_s23 + $0x30] sm:$0xff] %v454_v0  ;;  %604 = vst [vmem:[%s1374_s23 + $0xb0] sm:$0xff] %v534_v1  ;;  %v823_v2 = vpop.f32.mrb[8].mxu0  ;;  %v847_v3 = vpop.f32.mrb[8].mxu1 }
 0x154   : > { %v469_v4 = vadd.f32 %v823_v2, %v1366_v33  ;;  %v549_v5 = vadd.f32 %v847_v3, %v1366_v33  ;;  %v463_v6 = vpop.f32.mrb[9].mxu0  ;;  %v543_v7 = vpop.f32.mrb[9].mxu1 }
 0x155   : > { %v464_v8 = vadd.f32 %v1366_v33, %v463_v6  ;;  %v544_v9 = vadd.f32 %v1366_v33, %v543_v7 }
 0x156   : > { %591 = vst [vmem:[%s1374_s23 + $0x48] sm:$0xff] %v469_v4  ;;  %607 = vst [vmem:[%s1374_s23 + $0xc8] sm:$0xff] %v549_v5 }
 0x157   : > { %590 = vst [vmem:[%s1374_s23 + $0x40] sm:$0xff] %v464_v8  ;;  %606 = vst [vmem:[%s1374_s23 + $0xc0] sm:$0xff] %v544_v9  ;;  %v826_v10 = vpop.f32.mrb[10].mxu0  ;;  %v850_v11 = vpop.f32.mrb[10].mxu1 }
 0x158   : > { %v479_v12 = vadd.f32 %v826_v10, %v1366_v33  ;;  %v559_v13 = vadd.f32 %v850_v11, %v1366_v33  ;;  %v473_v14 = vpop.f32.mrb[11].mxu0  ;;  %v553_v15 = vpop.f32.mrb[11].mxu1 }
 0x159   : > { %v474_v16 = vadd.f32 %v1366_v33, %v473_v14  ;;  %v554_v17 = vadd.f32 %v1366_v33, %v553_v15 }
 0x15a   : > { %593 = vst [vmem:[%s1374_s23 + $0x58] sm:$0xff] %v479_v12  ;;  %609 = vst [vmem:[%s1374_s23 + $0xd8] sm:$0xff] %v559_v13 }
 0x15b   : > { %592 = vst [vmem:[%s1374_s23 + $0x50] sm:$0xff] %v474_v16  ;;  %608 = vst [vmem:[%s1374_s23 + $0xd0] sm:$0xff] %v554_v17  ;;  %v829_v18 = vpop.f32.mrb[12].mxu0  ;;  %v853_v19 = vpop.f32.mrb[12].mxu1 }
 0x15c   : > { %v489_v20 = vadd.f32 %v829_v18, %v1366_v33  ;;  %v569_v21 = vadd.f32 %v853_v19, %v1366_v33  ;;  %v483_v22 = vpop.f32.mrb[13].mxu0  ;;  %v563_v23 = vpop.f32.mrb[13].mxu1 }
 0x15d   : > { %v484_v24 = vadd.f32 %v1366_v33, %v483_v22  ;;  %v564_v25 = vadd.f32 %v1366_v33, %v563_v23 }
 0x15e   : > { %595 = vst [vmem:[%s1374_s23 + $0x68] sm:$0xff] %v489_v20  ;;  %611 = vst [vmem:[%s1374_s23 + $0xe8] sm:$0xff] %v569_v21 }
 0x15f   : > { %594 = vst [vmem:[%s1374_s23 + $0x60] sm:$0xff] %v484_v24  ;;  %610 = vst [vmem:[%s1374_s23 + $0xe0] sm:$0xff] %v564_v25  ;;  %v832_v26 = vpop.f32.mrb[14].mxu0  ;;  %v856_v27 = vpop.f32.mrb[14].mxu1 }
 0x160   : > { %v499_v28 = vadd.f32 %v832_v26, %v1366_v33  ;;  %v579_v29 = vadd.f32 %v856_v27, %v1366_v33  ;;  %v493_v30 = vpop.f32.mrb[15].mxu0  ;;  %v573_v31 = vpop.f32.mrb[15].mxu1 }
 0x161   : > { %v494_v32 = vadd.f32 %v1366_v33, %v493_v30  ;;  %v574_v34 = vadd.f32 %v1366_v33, %v573_v31 }
 0x162   : > { %597 = vst [vmem:[%s1374_s23 + $0x78] sm:$0xff] %v499_v28  ;;  %613 = vst [vmem:[%s1374_s23 + $0xf8] sm:$0xff] %v579_v29 }
 0x163   : > { %596 = vst [vmem:[%s1374_s23 + $0x70] sm:$0xff] %v494_v32  ;;  %612 = vst [vmem:[%s1374_s23 + $0xf0] sm:$0xff] %v574_v34 }
 0x164   : > { %1029 = shalt.err (!%p1026_p6)
}
 0x165   : > { %s1030_s4 = scalar_lea.hbm %s1435_s9, 4096  ;;  %s1034_s29 = scalar_lea.hbm %s1490_s3, 8192 }
 0x166   : > { %p1031_p12 = scmp.ne.s32.totalorder %s1435_s9, %s1030_s4  ;;  %p1035_p11 = scmp.lt.u32.totalorder %s1435_s9, %s1490_s3 }
 0x167   : > { %p1036_p7 = scmp.lt.u32.totalorder %s1034_s29, %s1030_s4  ;;  %p1038_p8 = scmp.lt.u32.totalorder %s1030_s4, %s1435_s9 }
 0x168   : > { %p1032_p13 = pnand %p1031_p12, %p1509_p4 }
 0x169   : > { %p1037_p3 = por %p1036_p7, %p1035_p11 }
 0x16a   : > { %p1033_p1 = pneg %p1032_p13 }
 0x16b   : > { %p1039_p5 = por %p1038_p8, %p1037_p3 }
 0x16d   : > { %p1040_p10 = pnand %p1039_p5, %p1033_p1 }
 0x16f   : > { %1043 = shalt.err (!%p1040_p10)
}
 0x170   : > { %s1094_s17 = smov 128   ;;  %s1095_s23 = smov 8  }
 0x171   : > { %869 = dma.vmem_to_hbm [thread:$0]  (%p1509_p4), %s1437_s30, 4096, %s1435_s9, %s615_s10, %s1094_s17, %s1094_s17, %s1095_s23  }
 0x172 PF: > { %s643_s26 = sand.u32 1, %s1074_s12   ;;  %p1510_p2 = scmp.ne.s32.totalorder %s1499_s25, 0 }
 0x173   : > { %p1511_p0 = scmp.ge.s32.totalorder %s1086_s15, 2  ;;  %s644_s16 = scalar_lea.sflag [#allocation4], %s643_s26 }
 0x175   : > { %p883_p9 = pnand %p1511_p0, %p1510_p2 }
 0x177   : > { %1069 = dma.done.wait (!%p883_p9), %s644_s16, 4096  }
 0x178   : > { %1071 = vsyncadd (!%p883_p9), %s644_s16, 4294963200  ;;  %p17_p6 = scmp.ge.s32.totalorder %s1141_s18, 4   ;;  %s1512_s12 = smov %s1078_s13 }
 0x179   : > { %s1513_s13 = smov %s1082_s14  ;;  %s1514_s14 = smov %s1153_s21 }
 0x17a   : > { %s1515_s15 = smov %s1141_s18  ;;  %19 = sbr.rel (!%p17_p6) target bundleno = 6 (0x6), region = 85 }
 0x181   :  { %649 = vsyncpa [#allocation3], 1 }
 0x182   :  { %651 = vsyncpa [#allocation3 + $0x1], 1 }
 0x183   :  { %652 = vsyncpa [#allocation6], 1 }
 0x184   :  { %653 = vsyncpa [#allocation4], 1 }
 0x185   :  { %655 = vsyncpa [#allocation4 + $0x1], 1 }

</bundles_post_ra>
